<compile_context>
chip_gen: v6e
topology: v6e:2x2x1
jax: 0.10.0
libtpu: 0.0.40
codegen_flags: <defaults>
</compile_context>

<pallas_src>
import functools

import jax
import jax.numpy as jnp
from jax.experimental import pallas as pl
from jax.experimental.pallas import tpu as pltpu


def expand_kernel(x_ref, w_ref, b_ref, o_ref):
    # x_ref: (9*Cin, H*W)   im2col for one batch element (channels-major)
    # w_ref: (E1+E3, 9*Cin) combined 1x1 + 3x3 weight
    # b_ref: (E1+E3, 1)     combined bias
    # o_ref: (E1+E3, H*W)   channels-major (flattened-NCHW) output slab
    acc = jnp.dot(w_ref[...], x_ref[...], preferred_element_type=jnp.float32)
    o_ref[...] = (acc + b_ref[...]).astype(o_ref.dtype)


@functools.partial(jax.jit, static_argnames=())
def expand_forward(x_nchw, w1_oihw, b1, w3_oihw, b3):
    """Matches Expand.forward: returns NCHW tensor of shape (N, E1+E3, H, W)."""
    N, Cin, H, W = x_nchw.shape
    E1 = w1_oihw.shape[0]
    E3 = w3_oihw.shape[0]
    Cout = E1 + E3
    K = 9 * Cin
    HW = H * W

    # ---- Wrapper-side im2col (channels-major, lane axis = H*W) -------------
    # Column index of tap (dy, dx), channel c is  (dy*3 + dx)*Cin + c.
    x_pad = jnp.pad(x_nchw, ((0, 0), (0, 0), (1, 1), (1, 1)))
    taps = [x_pad[:, :, dy:dy + H, dx:dx + W]
            for dy in range(3) for dx in range(3)]          # 9 x (N, Cin, H, W)
    xcol = jnp.stack(taps, axis=1).reshape(N, K, HW)        # (N, 9*Cin, H*W)

    # ---- Combined weight / bias --------------------------------------------
    # Rows 0..E1-1  : 1x1 weight, only in the center-tap columns (dy=dx=1).
    # Rows E1..Cout : 3x3 weight, all tap columns, ordered (dy, dx, c).
    w1_mat = w1_oihw[:, :, 0, 0]                             # (E1, Cin)
    w1_rows = jnp.zeros((E1, K), x_nchw.dtype).at[:, 4 * Cin:5 * Cin].set(w1_mat)
    w3_rows = jnp.transpose(w3_oihw, (0, 2, 3, 1)).reshape(E3, K)  # (E3, 9*Cin)
    w_comb = jnp.concatenate([w1_rows, w3_rows], axis=0)     # (Cout, 9*Cin)
    b_comb = jnp.concatenate([b1, b3]).reshape(Cout, 1)      # (Cout, 1)

    out_flat = pl.pallas_call(
        expand_kernel,
        out_shape=jax.ShapeDtypeStruct((N, Cout, HW), x_nchw.dtype),
        grid_spec=pltpu.PrefetchScalarGridSpec(
            num_scalar_prefetch=0,
            grid=(N,),
            in_specs=[
                pl.BlockSpec((None, K, HW), lambda n: (n, 0, 0)),
                pl.BlockSpec((Cout, K), lambda n: (0, 0)),
                pl.BlockSpec((Cout, 1), lambda n: (0, 0)),
            ],
            out_specs=pl.BlockSpec((None, Cout, HW), lambda n: (n, 0, 0)),
        ),
        compiler_params=pltpu.CompilerParams(
            dimension_semantics=("parallel",)),
    )(xcol, w_comb, b_comb)

    # Channels-major slab is already flattened NCHW -> plain reshape, no transpose.
    return out_flat.reshape(N, Cout, H, W)


def _reference(x_nchw, w1_oihw, b1, w3_oihw, b3):
    """Pure-JAX reference (lax conv) for correctness check."""
    dn = jax.lax.conv_dimension_numbers(x_nchw.shape, w1_oihw.shape,
                                        ("NCHW", "OIHW", "NCHW"))
    o1 = jax.lax.conv_general_dilated(x_nchw, w1_oihw, (1, 1), "VALID",
                                      dimension_numbers=dn)
    o1 = o1 + b1.reshape(1, -1, 1, 1)
    dn3 = jax.lax.conv_dimension_numbers(x_nchw.shape, w3_oihw.shape,
                                         ("NCHW", "OIHW", "NCHW"))
    o3 = jax.lax.conv_general_dilated(x_nchw, w3_oihw, (1, 1),
                                      [(1, 1), (1, 1)],
                                      dimension_numbers=dn3)
    o3 = o3 + b3.reshape(1, -1, 1, 1)
    return jnp.concatenate([o1, o3], axis=1)


if __name__ == "__main__":
    # Small shapes consistent with the module: batch=2, in_channels=4,
    # spatial 16x16, e1_out_channels=8, e3_out_channels=8.
    N, Cin, H, W = 2, 4, 16, 16
    E1, E3 = 8, 8

    key = jax.random.PRNGKey(0)
    kx, k1w, k1b, k3w, k3b = jax.random.split(key, 5)

    x = jax.random.normal(kx, (N, Cin, H, W), dtype=jnp.float32)
    # Deterministic parameter init (PyTorch OIHW shapes from __init__).
    w1 = jax.random.normal(k1w, (E1, Cin, 1, 1), dtype=jnp.float32) * 0.1
    b1 = jax.random.normal(k1b, (E1,), dtype=jnp.float32) * 0.1
    w3 = jax.random.normal(k3w, (E3, Cin, 3, 3), dtype=jnp.float32) * 0.1
    b3 = jax.random.normal(k3b, (E3,), dtype=jnp.float32) * 0.1

    out = expand_forward(x, w1, b1, w3, b3)
    out = jax.block_until_ready(out)

    ref = jax.block_until_ready(_reference(x, w1, b1, w3, b3))
    assert out.shape == (N, E1 + E3, H, W), out.shape
    assert jnp.allclose(out, ref, atol=1e-4, rtol=1e-4), \
        float(jnp.max(jnp.abs(out - ref)))

    print("KERNEL_OK")
</pallas_src>

<mosaic_0001>
module attributes {stable_mosaic.version = 11 : i64} {
  func.func @expand_kernel(%arg0: i32, %arg1: memref<1x36x256xf32, #tpu.memory_space<vmem>>, %arg2: memref<16x36xf32, #tpu.memory_space<vmem>>, %arg3: memref<16x1xf32, #tpu.memory_space<vmem>>, %arg4: memref<1x16x256xf32, #tpu.memory_space<vmem>>) attributes {dimension_semantics = [#tpu.dimension_semantics<parallel>], iteration_bounds = array<i64: 2>, scalar_prefetch = 0 : i64, scratch_operands = 0 : i64, tpu.core_type = #tpu.core_type<tc>, window_params = [{transform_indices = @transform_0, window_bounds = array<i64: 1, 36, 256>}, {pipeline_mode = #tpu.pipeline_mode<synchronous>, transform_indices = @transform_1, window_bounds = array<i64: 16, 36>}, {pipeline_mode = #tpu.pipeline_mode<synchronous>, transform_indices = @transform_2, window_bounds = array<i64: 16, 1>}, {transform_indices = @transform_3, window_bounds = array<i64: 1, 16, 256>}]} {
    %c0 = arith.constant 0 : index
    %c0_0 = arith.constant 0 : index
    %0 = vector.load %arg2[%c0, %c0_0] : memref<16x36xf32, #tpu.memory_space<vmem>>, vector<16x36xf32>
    %c0_1 = arith.constant 0 : index
    %c0_2 = arith.constant 0 : index
    %c0_3 = arith.constant 0 : index
    %1 = vector.load %arg1[%c0_1, %c0_2, %c0_3] : memref<1x36x256xf32, #tpu.memory_space<vmem>>, vector<1x36x256xf32>
    %2 = vector.shape_cast %1 : vector<1x36x256xf32> to vector<36x256xf32>
    %cst = arith.constant dense<0.000000e+00> : vector<16x256xf32>
    %3 = tpu.matmul %0, %2, %cst {dimension_numbers = #tpu.dot_dimension_numbers<[1], [0], [0], [1], [0, 0, 1, 1], [], []>} : vector<16x36xf32>, vector<36x256xf32>, vector<16x256xf32> -> vector<16x256xf32>
    %c0_4 = arith.constant 0 : index
    %c0_5 = arith.constant 0 : index
    %4 = vector.load %arg3[%c0_4, %c0_5] : memref<16x1xf32, #tpu.memory_space<vmem>>, vector<16x1xf32>
    %5 = vector.broadcast %4 : vector<16x1xf32> to vector<16x256xf32>
    %6 = arith.addf %3, %5 : vector<16x256xf32>
    %c0_6 = arith.constant 0 : index
    %c0_7 = arith.constant 0 : index
    %c0_8 = arith.constant 0 : index
    %7 = vector.load %arg4[%c0_6, %c0_7, %c0_8] : memref<1x16x256xf32, #tpu.memory_space<vmem>>, vector<1x16x256xf32>
    %8 = vector.shape_cast %7 : vector<1x16x256xf32> to vector<16x256xf32>
    %9 = vector.shape_cast %6 : vector<16x256xf32> to vector<1x16x256xf32>
    tpu.vector_store %arg4[%c0_6, %c0_7, %c0_8], %9 {strides = array<i32>} : memref<1x16x256xf32, #tpu.memory_space<vmem>>, vector<1x16x256xf32>,
    return
  }
  func.func @transform_0(%arg0: i32) -> (i32, i32, i32) {
    %c0_i32 = arith.constant 0 : i32
    %c0_i32_0 = arith.constant 0 : i32
    %c0_i32_1 = arith.constant 0 : i32
    return %arg0, %c0_i32, %c0_i32_0 : i32, i32, i32
  }
  func.func @transform_1(%arg0: i32) -> (i32, i32) {
    %c0_i32 = arith.constant 0 : i32
    %c0_i32_0 = arith.constant 0 : i32
    %c0_i32_1 = arith.constant 0 : i32
    return %c0_i32, %c0_i32_0 : i32, i32
  }
  func.func @transform_2(%arg0: i32) -> (i32, i32) {
    %c0_i32 = arith.constant 0 : i32
    %c0_i32_0 = arith.constant 0 : i32
    %c0_i32_1 = arith.constant 0 : i32
    return %c0_i32, %c0_i32_0 : i32, i32
  }
  func.func @transform_3(%arg0: i32) -> (i32, i32, i32) {
    %c0_i32 = arith.constant 0 : i32
    %c0_i32_0 = arith.constant 0 : i32
    %c0_i32_1 = arith.constant 0 : i32
    return %arg0, %c0_i32, %c0_i32_0 : i32, i32, i32
  }
}

</mosaic_0001>

<bundles_post_ra>
// kernel: expand_forward.1
= control target key start
LH: loop header
LB: loop body
LE: loop exit
PB: predicated region body
PF: predicated region fallthrough
CT: control target
= control target key end

     0   :  { %s412_s12 = smov 0   ;;  %s445_s0 = inlined_call_operand.vmem [shape: f32[2,36,256], index: 0, kind: input, shape index: {}]   ;;  %s446_s1 = inlined_call_operand.vmem [shape: f32[16,36], index: 1, kind: input, shape index: {}]   ;;  %s447_s2 = inlined_call_operand.vmem [shape: f32[16,1], index: 2, kind: input, shape index: {}]   ;;  %s448_s3 = inlined_call_operand.vmem [shape: f32[2,16,256], index: 3, kind: output, shape index: {}]  }
   0x1 LB: > { %s345_s13 = sadd.s32 4294967295, %s388_s12   ;;  %p349_p0 = scmp.ge.s32.totalorder %s388_s12, 1  ;;  %s388_s12 = sphi %s412_s12, %s13_s12  }
   0x2   : > { %p137_p1 = scmp.lt.s32.totalorder %s388_s12, 3 }
   0x4   : > { %p138_p2 = pnand %p349_p0, %p137_p1 }
   0x5   : > { %p161_p3 = scmp.lt.s32.totalorder (!%p138_p2), %s345_s13, 1 }
   0x6   : > { %141 = sbr.rel (%p138_p2) target bundleno = 225 (0xe1), region = 32 }
   0xb   : > { %v390_v0 = vmov 0.0   ;;  %v183_v1 = vld [vmem:[%s447_s2] sm:$0xff]  ;;  %s450_s13 = smov (!%p161_p3, %s345_s13), 1  ;;  %v391_v2 = vmov 0   ;;  %v184_v3 = vld [vmem:[%s447_s2 + $0x8] sm:$0xff]  ;;  %vm202_vm0 = vcmask 1043456  }
   0xc   : > { %273 = vmatprep.mubr.f32.mxu0 %v390_v0  ;;  %279 = vmatprep.mubr.f32.mxu1 %v390_v0  ;;  %s370_s16 = smul.u32 80, %s450_s13  ;;  %v171_v14 = vld [vmem:[%s446_s1] sm:$0xff]  ;;  %vm195_vm1 = vcmask 293888   ;;  %v172_v15 = vld [vmem:[%s446_s1 + $0x8] sm:$0xff]  ;;  %s359_s26 = sshll.u32 %s450_s13, 5 }
   0xd   : > { %381 = vset.pattern.permute.xlu0 %v391_v2  ;;  %s170_s29 = scalar_lea.vmem %s448_s3, %s359_s26 }
   0xe   : > { %187 = vperm.xlu0 %381, %v183_v1   ;;  %s165_s21 = scalar_lea.vmem %s445_s0, %s370_s16 }
   0xf   : > { %v182_v4 = vld [vmem:[%s165_s21 + $0x48] sm:$0xf]  ;;  %v181_v5 = vld [vmem:[%s165_s21 + $0x40] sm:$0xf]  ;;  %v180_v6 = vld [vmem:[%s165_s21 + $0x38] sm:$0xff] }
  0x10   : > { %353 = vmatprep.subr.msk.mxu0 %vm202_vm0, %v182_v4  ;;  %360 = vmatprep.subr.msk.mxu1 %vm202_vm0, %v182_v4  ;;  %v179_v7 = vld [vmem:[%s165_s21 + $0x30] sm:$0xff]  ;;  %v178_v8 = vld [vmem:[%s165_s21 + $0x28] sm:$0xff]  ;;  %v177_v9 = vld [vmem:[%s165_s21 + $0x20] sm:$0xff] }
  0x11   : > { %354 = vmatpush1.msk.msra.mxu0 %vm202_vm0, %v181_v5  ;;  %365 = vmatpush1.msk.msra.mxu1 %vm202_vm0, %v181_v5  ;;  %v176_v10 = vld [vmem:[%s165_s21 + $0x18] sm:$0xff]  ;;  %v175_v11 = vld [vmem:[%s165_s21 + $0x10] sm:$0xff]  ;;  %v174_v12 = vld [vmem:[%s165_s21 + $0x8] sm:$0xff] }
  0x12   : > { %192 = vperm.xlu0 %381, %v184_v3   ;;  %233 = vmatprep.subr.mxu0 %v180_v6  ;;  %v173_v13 = vld [vmem:[%s165_s21] sm:$0xff] }
  0x13   : > { %361 = vmatprep.subr.mxu1 %v180_v6  ;;  %234 = vmatpush1.msra.mxu0 %v179_v7 }
  0x14   : > { %366 = vmatpush1.msra.mxu1 %v179_v7  ;;  %235 = vmatprep.subr.mxu0 %v178_v8 }
  0x15   : > { %362 = vmatprep.subr.mxu1 %v178_v8  ;;  %236 = vmatpush1.msra.mxu0 %v177_v9 }
  0x16   : > { %367 = vmatpush1.msra.mxu1 %v177_v9  ;;  %237 = vmatprep.subr.mxu0 %v176_v10 }
  0x17   : > { %363 = vmatprep.subr.mxu1 %v176_v10  ;;  %238 = vmatpush1.msra.mxu0 %v175_v11 }
  0x18   : > { %368 = vmatpush1.msra.mxu1 %v175_v11  ;;  %239 = vmatprep.subr.mxu0 %v174_v12 }
  0x19   : > { %364 = vmatprep.subr.mxu1 %v174_v12  ;;  %240 = vmatpush1.msra.mxu0 %v173_v13 }
  0x1a   : > { %369 = vmatpush1.msra.mxu1 %v173_v13  ;;  %355 = vmatmul.mubr.msk.f32.vlgmr.msra.gmra.mxu0 %vm195_vm1, %v171_v14 }
  0x1b   : > { %356 = vmatmul.mubr.msk.f32.vlgmr.msra.gmra.mxu1 %vm195_vm1, %v172_v15 }
  0x89   : > { %v188_v16 = vpop.permute.xlu0 %187 }
  0x8d   : > { %v193_v17 = vpop.permute.xlu0 %192 }
  0xda   : > { %v275_v18 = vpop.f32.mrf.mxu0 }
  0xdb   : > { %v281_v19 = vpop.f32.mrf.mxu1  ;;  %v276_v20 = vadd.f32 %v275_v18, %v188_v16 }
  0xdc   : > { %v282_v21 = vadd.f32 %v281_v19, %v193_v17  ;;  %v277_v22 = vpop.f32.mrf.mxu0 }
  0xdd   : > { %v283_v23 = vpop.f32.mrf.mxu1  ;;  %286 = vst [vmem:[%s170_s29] sm:$0xff] %v276_v20  ;;  %v278_v24 = vadd.f32 %v277_v22, %v188_v16 }
  0xde   : > { %288 = vst [vmem:[%s170_s29 + $0x10] sm:$0xff] %v282_v21  ;;  %v284_v25 = vadd.f32 %v283_v23, %v193_v17 }
  0xdf   : > { %287 = vst [vmem:[%s170_s29 + $0x8] sm:$0xff] %v278_v24 }
  0xe0   : > { %289 = vst [vmem:[%s170_s29 + $0x18] sm:$0xff] %v284_v25 }
  0xe1 PF: > { %s13_s12 = sadd.s32 1, %s388_s12  }
  0xe2   : > { %p10_p4 = scmp.ge.s32.totalorder %s13_s12, 4  }
  0xe4   :  { %12 = sbr.rel (!%p10_p4) target bundleno = 1 (0x1), region = 62 }

</bundles_post_ra>
